<compile_context>
chip_gen: v5e
topology: v5e:2x2
jax: 0.10.0
libtpu: 0.0.40
codegen_flags: <defaults>
</compile_context>

<pallas_src>
import jax
import jax.numpy as jnp
from jax import lax
from jax.experimental import pallas as pl
from jax.experimental.pallas import tpu as pltpu

LEAKY_SLOPE = 0.01  # torch.nn.functional.leaky_relu default


def _round_up(x, m):
    return (x + m - 1) // m * m


def _leaky_relu(x):
    return jnp.where(x >= 0, x, LEAKY_SLOPE * x)


def critic_kernel(x_ref, w1_ref, b1_ref, w2_ref, b2_ref, w3r_ref, b3_ref,
                  o_ref):
    # x:(TB,S+A) bf16   w1:(S+A,H1P) bf16  b1:(1,H1P) f32
    # w2:(H1P,H2P) bf16 b2:(1,H2P) f32     w3r:(1,H2P) f32
    # b3: SMEM (1,) f32                    o:(1,TB) f32
    # fc1: single K=S+A dot on the packed [state|action] tile.
    h1 = jnp.dot(x_ref[...], w1_ref[...],
                 preferred_element_type=jnp.float32) + b1_ref[...]
    h1 = _leaky_relu(h1)                                  # (TB, H1P) f32

    # fc2
    h2 = jnp.dot(h1.astype(w2_ref.dtype), w2_ref[...],
                 preferred_element_type=jnp.float32) + b2_ref[...]
    h2 = _leaky_relu(h2)                                  # (TB, H2P) f32

    # fc3: contract the H2P axes of (1,H2P) x (TB,H2P) -> (1,TB) lane-dense
    # row (f32 throughout; tiny M=1 matmul).
    q = lax.dot_general(w3r_ref[...], h2,
                        dimension_numbers=(((1,), (1,)), ((), ())),
                        preferred_element_type=jnp.float32)
    o_ref[...] = (q + b3_ref[0]).astype(o_ref.dtype)


def prepare_params(params, use_bf16=True):
    """One-time param prep: zero-pad hidden dims to lane-aligned widths
    (200->256, 100->128), cast MXU operands (w1, w2) to bf16, keep biases and
    the fc3 row in f32. Padding is bit-exact (leaky_relu(0) = 0)."""
    w1, b1, w2, b2, w3, b3 = params      # w1:(S+A,200) w2:(200,100) w3:(100,1)
    H1, H2 = w1.shape[1], w2.shape[1]
    H1P, H2P = _round_up(H1, 128), _round_up(H2, 128)
    mxu_dtype = jnp.bfloat16 if use_bf16 else jnp.float32

    w1p = jnp.pad(w1, ((0, 0), (0, H1P - H1))).astype(mxu_dtype)
    b1p = jnp.pad(b1.reshape(1, H1), ((0, 0), (0, H1P - H1))).astype(jnp.float32)
    w2p = jnp.pad(w2, ((0, H1P - H1), (0, H2P - H2))).astype(mxu_dtype)
    b2p = jnp.pad(b2.reshape(1, H2), ((0, 0), (0, H2P - H2))).astype(jnp.float32)
    w3r = jnp.pad(w3.reshape(1, H2), ((0, 0), (0, H2P - H2))).astype(jnp.float32)
    b3p = jnp.reshape(b3, (1,)).astype(jnp.float32)
    return (w1p, b1p, w2p, b2p, w3r, b3p)


def _choose_tb(B, tb_request):
    """Batch tile: small batches only round up to the sublane multiple (8);
    large batches use big tiles (fewer grid steps) but at least 2 balanced
    tiles so v7x's second TensorCore gets work."""
    if B <= 128:
        return _round_up(B, 8)
    tb = _round_up(max(tb_request, 128), 128)
    return min(tb, _round_up(pl.cdiv(B, 2), 128))


def critic_forward(state, action, prep, *, tb=512):
    """state: (B, state_dim), action: (B, action_dim) -> q: (B,)"""
    w1, b1, w2, b2, w3r, b3 = prep
    B = state.shape[0]
    SA = w1.shape[0]                       # state_dim + action_dim
    H1P, H2P = w1.shape[1], w2.shape[1]

    # Pack [state|action] once (contiguous rows, single fc1 dot) and pre-cast
    # to the MXU operand dtype so the kernel does no activation casts for fc1.
    x = jnp.concatenate([state, action], axis=1).astype(w1.dtype)  # (B, SA)

    tb_eff = _choose_tb(B, tb)
    b_pad = _round_up(B, tb_eff)
    if b_pad != B:   # only the ragged tail is padded
        x = jnp.pad(x, ((0, b_pad - B), (0, 0)))
    num_tiles = b_pad // tb_eff

    weight_bytes = sum(int(a.size) * a.dtype.itemsize for a in prep)
    cost = pl.CostEstimate(
        flops=2 * b_pad * (SA * H1P + H1P * H2P + H2P),
        transcendentals=0,
        bytes_accessed=b_pad * SA * x.dtype.itemsize + b_pad * 4 + weight_bytes,
    )

    out = pl.pallas_call(
        critic_kernel,
        out_shape=jax.ShapeDtypeStruct((1, b_pad), jnp.float32),
        grid=(num_tiles,),
        in_specs=[
            pl.BlockSpec((tb_eff, SA), lambda i: (i, 0)),   # packed input tile
            pl.BlockSpec((SA, H1P), lambda i: (0, 0)),      # w1   (resident)
            pl.BlockSpec((1, H1P), lambda i: (0, 0)),       # b1
            pl.BlockSpec((H1P, H2P), lambda i: (0, 0)),     # w2   (resident)
            pl.BlockSpec((1, H2P), lambda i: (0, 0)),       # b2
            pl.BlockSpec((1, H2P), lambda i: (0, 0)),       # w3 row
            pl.BlockSpec(memory_space=pltpu.MemorySpace.SMEM),  # b3 scalar
        ],
        out_specs=pl.BlockSpec((1, tb_eff), lambda i: (0, i)),  # lane-dense row
        compiler_params=pltpu.CompilerParams(
            dimension_semantics=("parallel",)),
        cost_estimate=cost,
    )(x, w1, b1, w2, b2, w3r, b3)
    return out[0, :B]


def init_params(state_dim, action_dim, key):
    """Deterministic PyTorch-Linear-style init (uniform in +/- 1/sqrt(fan_in)).
    Weights are stored as (in_features, out_features)."""
    dims = [(state_dim + action_dim, 200), (200, 100), (100, 1)]
    params = []
    for (fan_in, fan_out) in dims:
        key, kw, kb = jax.random.split(key, 3)
        bound = 1.0 / jnp.sqrt(jnp.float32(fan_in))
        w = jax.random.uniform(kw, (fan_in, fan_out), jnp.float32, -bound, bound)
        b = jax.random.uniform(kb, (1, fan_out), jnp.float32, -bound, bound)
        params += [w, b]
    return tuple(params)


def critic_ref(state, action, params):
    """Pure-JAX f32 reference for correctness checking."""
    w1, b1, w2, b2, w3, b3 = params
    x = jnp.concatenate([state, action], axis=1)
    h = jax.nn.leaky_relu(x @ w1 + b1, LEAKY_SLOPE)
    h = jax.nn.leaky_relu(h @ w2 + b2, LEAKY_SLOPE)
    return jnp.squeeze(h @ w3 + b3, axis=-1)


if __name__ == "__main__":
    key = jax.random.PRNGKey(0)
    state_dim, action_dim, batch = 16, 4, 8

    k_s, k_a, k_p = jax.random.split(key, 3)
    state = jax.random.normal(k_s, (batch, state_dim), jnp.float32)
    action = jax.random.normal(k_a, (batch, action_dim), jnp.float32)
    params = init_params(state_dim, action_dim, k_p)
    prep = prepare_params(params, use_bf16=True)

    q = jax.block_until_ready(critic_forward(state, action, prep))
    q_ref = critic_ref(state, action, params)

    assert q.shape == (batch,)
    # bf16 MXU operands / bf16 input cast (f32 accumulation) vs f32 reference.
    assert jnp.allclose(q, q_ref, atol=2e-2, rtol=2e-2), (q, q_ref)
    print("KERNEL_OK")
</pallas_src>

<mosaic_0001>
module attributes {stable_mosaic.version = 11 : i64} {
  func.func @critic_kernel(%arg0: i32, %arg1: memref<8x20xbf16, #tpu.memory_space<vmem>>, %arg2: memref<20x256xbf16, #tpu.memory_space<vmem>>, %arg3: memref<1x256xf32, #tpu.memory_space<vmem>>, %arg4: memref<256x128xbf16, #tpu.memory_space<vmem>>, %arg5: memref<1x128xf32, #tpu.memory_space<vmem>>, %arg6: memref<1x128xf32, #tpu.memory_space<vmem>>, %arg7: memref<1xf32, #tpu.memory_space<smem>>, %arg8: memref<1x8xf32, #tpu.memory_space<vmem>>) attributes {dimension_semantics = [#tpu.dimension_semantics<parallel>], iteration_bounds = array<i64: 1>, scalar_prefetch = 0 : i64, scratch_operands = 0 : i64, tpu.core_type = #tpu.core_type<tc>, window_params = [{transform_indices = @transform_0, window_bounds = array<i64: 8, 20>}, {pipeline_mode = #tpu.pipeline_mode<synchronous>, transform_indices = @transform_1, window_bounds = array<i64: 20, 256>}, {pipeline_mode = #tpu.pipeline_mode<synchronous>, transform_indices = @transform_2, window_bounds = array<i64: 1, 256>}, {pipeline_mode = #tpu.pipeline_mode<synchronous>, transform_indices = @transform_3, window_bounds = array<i64: 256, 128>}, {pipeline_mode = #tpu.pipeline_mode<synchronous>, transform_indices = @transform_4, window_bounds = array<i64: 1, 128>}, {pipeline_mode = #tpu.pipeline_mode<synchronous>, transform_indices = @transform_5, window_bounds = array<i64: 1, 128>}, {transform_indices = @transform_6, window_bounds = array<i64: 1>}, {transform_indices = @transform_7, window_bounds = array<i64: 1, 8>}]} {
    %c0 = arith.constant 0 : index
    %c0_0 = arith.constant 0 : index
    %0 = vector.load %arg1[%c0, %c0_0] : memref<8x20xbf16, #tpu.memory_space<vmem>>, vector<8x20xbf16>
    %c0_1 = arith.constant 0 : index
    %c0_2 = arith.constant 0 : index
    %1 = vector.load %arg2[%c0_1, %c0_2] : memref<20x256xbf16, #tpu.memory_space<vmem>>, vector<20x256xbf16>
    %cst = arith.constant dense<0.000000e+00> : vector<8x256xf32>
    %2 = tpu.matmul %0, %1, %cst {dimension_numbers = #tpu.dot_dimension_numbers<[1], [0], [0], [1], [0, 0, 1, 1], [], []>} : vector<8x20xbf16>, vector<20x256xbf16>, vector<8x256xf32> -> vector<8x256xf32>
    %c0_3 = arith.constant 0 : index
    %c0_4 = arith.constant 0 : index
    %3 = vector.load %arg3[%c0_3, %c0_4] : memref<1x256xf32, #tpu.memory_space<vmem>>, vector<1x256xf32>
    %4 = vector.broadcast %3 : vector<1x256xf32> to vector<8x256xf32>
    %5 = arith.addf %2, %4 : vector<8x256xf32>
    %cst_5 = arith.constant 0.000000e+00 : f32
    %6 = vector.broadcast %cst_5 : f32 to vector<8x256xf32>
    %7 = arith.cmpf oge, %5, %6 : vector<8x256xf32>
    %cst_6 = arith.constant 0.00999999977 : f32
    %8 = vector.broadcast %cst_6 : f32 to vector<8x256xf32>
    %9 = arith.mulf %8, %5 : vector<8x256xf32>
    %10 = arith.select %7, %5, %9 : vector<8x256xi1>, vector<8x256xf32>
    %11 = arith.truncf %10 : vector<8x256xf32> to vector<8x256xbf16>
    %c0_7 = arith.constant 0 : index
    %c0_8 = arith.constant 0 : index
    %12 = vector.load %arg4[%c0_7, %c0_8] : memref<256x128xbf16, #tpu.memory_space<vmem>>, vector<256x128xbf16>
    %cst_9 = arith.constant dense<0.000000e+00> : vector<8x128xf32>
    %13 = tpu.matmul %11, %12, %cst_9 {dimension_numbers = #tpu.dot_dimension_numbers<[1], [0], [0], [1], [0, 0, 1, 1], [], []>} : vector<8x256xbf16>, vector<256x128xbf16>, vector<8x128xf32> -> vector<8x128xf32>
    %c0_10 = arith.constant 0 : index
    %c0_11 = arith.constant 0 : index
    %14 = vector.load %arg5[%c0_10, %c0_11] : memref<1x128xf32, #tpu.memory_space<vmem>>, vector<1x128xf32>
    %15 = vector.broadcast %14 : vector<1x128xf32> to vector<8x128xf32>
    %16 = arith.addf %13, %15 : vector<8x128xf32>
    %cst_12 = arith.constant 0.000000e+00 : f32
    %17 = vector.broadcast %cst_12 : f32 to vector<8x128xf32>
    %18 = arith.cmpf oge, %16, %17 : vector<8x128xf32>
    %cst_13 = arith.constant 0.00999999977 : f32
    %19 = vector.broadcast %cst_13 : f32 to vector<8x128xf32>
    %20 = arith.mulf %19, %16 : vector<8x128xf32>
    %21 = arith.select %18, %16, %20 : vector<8x128xi1>, vector<8x128xf32>
    %c0_14 = arith.constant 0 : index
    %c0_15 = arith.constant 0 : index
    %22 = vector.load %arg6[%c0_14, %c0_15] : memref<1x128xf32, #tpu.memory_space<vmem>>, vector<1x128xf32>
    %cst_16 = arith.constant dense<0.000000e+00> : vector<1x8xf32>
    %23 = tpu.matmul %22, %21, %cst_16 {dimension_numbers = #tpu.dot_dimension_numbers<[1], [1], [0], [0], [0, 0, 1, 0], [], []>} : vector<1x128xf32>, vector<8x128xf32>, vector<1x8xf32> -> vector<1x8xf32>
    %c0_17 = arith.constant 0 : index
    %24 = memref.load %arg7[%c0_17] : memref<1xf32, #tpu.memory_space<smem>>
    %25 = vector.broadcast %24 : f32 to vector<1x8xf32>
    %26 = arith.addf %23, %25 : vector<1x8xf32>
    %c0_18 = arith.constant 0 : index
    %c0_19 = arith.constant 0 : index
    %27 = vector.load %arg8[%c0_18, %c0_19] : memref<1x8xf32, #tpu.memory_space<vmem>>, vector<1x8xf32>
    tpu.vector_store %arg8[%c0_18, %c0_19], %26 {strides = array<i32>} : memref<1x8xf32, #tpu.memory_space<vmem>>, vector<1x8xf32>,
    return
  }
  func.func @transform_0(%arg0: i32) -> (i32, i32) {
    %c0_i32 = arith.constant 0 : i32
    %c0_i32_0 = arith.constant 0 : i32
    return %arg0, %c0_i32 : i32, i32
  }
  func.func @transform_1(%arg0: i32) -> (i32, i32) {
    %c0_i32 = arith.constant 0 : i32
    %c0_i32_0 = arith.constant 0 : i32
    %c0_i32_1 = arith.constant 0 : i32
    return %c0_i32, %c0_i32_0 : i32, i32
  }
  func.func @transform_2(%arg0: i32) -> (i32, i32) {
    %c0_i32 = arith.constant 0 : i32
    %c0_i32_0 = arith.constant 0 : i32
    %c0_i32_1 = arith.constant 0 : i32
    return %c0_i32, %c0_i32_0 : i32, i32
  }
  func.func @transform_3(%arg0: i32) -> (i32, i32) {
    %c0_i32 = arith.constant 0 : i32
    %c0_i32_0 = arith.constant 0 : i32
    %c0_i32_1 = arith.constant 0 : i32
    return %c0_i32, %c0_i32_0 : i32, i32
  }
  func.func @transform_4(%arg0: i32) -> (i32, i32) {
    %c0_i32 = arith.constant 0 : i32
    %c0_i32_0 = arith.constant 0 : i32
    %c0_i32_1 = arith.constant 0 : i32
    return %c0_i32, %c0_i32_0 : i32, i32
  }
  func.func @transform_5(%arg0: i32) -> (i32, i32) {
    %c0_i32 = arith.constant 0 : i32
    %c0_i32_0 = arith.constant 0 : i32
    %c0_i32_1 = arith.constant 0 : i32
    return %c0_i32, %c0_i32_0 : i32, i32
  }
  func.func @transform_6(%arg0: i32) -> i32 {
    %c0_i32 = arith.constant 0 : i32
    %c0_i32_0 = arith.constant 0 : i32
    return %c0_i32 : i32
  }
  func.func @transform_7(%arg0: i32) -> (i32, i32) {
    %c0_i32 = arith.constant 0 : i32
    %c0_i32_0 = arith.constant 0 : i32
    return %c0_i32, %arg0 : i32, i32
  }
}

</mosaic_0001>

<bundles_post_ra>
// kernel: tpu_custom_call.1
= control target key start
LH: loop header
LB: loop body
LE: loop exit
PB: predicated region body
PF: predicated region fallthrough
CT: control target
= control target key end

     0   :  { %13 = vsyncpa [#allocation4], 0  ;;  %s623_s0 = inlined_call_operand.hbm [shape: bf16[8,20], index: 0, kind: input, shape index: {}]   ;;  %s624_s1 = inlined_call_operand.hbm [shape: bf16[20,256], index: 1, kind: input, shape index: {}]   ;;  %s625_s2 = inlined_call_operand.vmem [shape: f32[1,256], index: 2, kind: input, shape index: {}]   ;;  %s626_s3 = inlined_call_operand.hbm [shape: bf16[256,128], index: 3, kind: input, shape index: {}]   ;;  %s627_s4 = inlined_call_operand.vmem [shape: f32[1,128], index: 4, kind: input, shape index: {}]   ;;  %s628_s5 = inlined_call_operand.vmem [shape: f32[1,128], index: 5, kind: input, shape index: {}]   ;;  %s629_s6 = inlined_call_operand.<no memory space> [shape: f32[1], index: 6, kind: input, shape index: {}]   ;;  %s630_s7 = inlined_call_operand.hbm [shape: f32[1,8], index: 7, kind: output, shape index: {}]  }
   0x1   :  { %14 = vsyncpa [#allocation7], 0  ;;  %s31_s26 = sshll.u32 %s624_s1, 4  ;;  %s32_s26 = int_to_ptr.hbm [resolvable:$true] %s31_s26 }
   0x2   :  { %15 = vsyncpa [#allocation5], 0  ;;  %s551_s27 = smov [#allocation6]   ;;  %s21_s8 = sshll.u32 %s623_s0, 4  ;;  %s22_s8 = int_to_ptr.hbm [resolvable:$true] %s21_s8 }
   0x3   :  { %s33_s28 = sshll.u32 %s551_s27, 4  ;;  %s552_s9 = smov 128   ;;  %s34_s28 = int_to_ptr.vmem [resolvable:$true] %s33_s28 }
   0x4   :  { %s553_s10 = smov 8   ;;  %s554_s11 = smov [#allocation3]  }
   0x5   :  { %39 = dma.hbm_to_vmem [thread:$0]  %s32_s26, 384, %s34_s28, [#allocation7], %s552_s9, %s552_s9, %s553_s10  }
   0x6   :  { %s23_s12 = sshll.u32 %s554_s11, 4  ;;  %s46_s15 = sshll.u32 %s626_s3, 4  ;;  %s24_s12 = int_to_ptr.vmem [resolvable:$true] %s23_s12  ;;  %s47_s15 = int_to_ptr.hbm [resolvable:$true] %s46_s15 }
   0x7   :  { %26 = dma.hbm_to_vmem [thread:$0]  %s22_s8, 64, %s24_s12, [#allocation4]  }
   0x8   :  { %s555_s1 = smov [#allocation8]   ;;  %s556_s17 = smov 64  }
   0x9   :  { %s48_s16 = sshll.u32 %s555_s1, 4  ;;  %s557_s18 = smov 4   ;;  %s49_s16 = int_to_ptr.vmem [resolvable:$true] %s48_s16 }
   0xa   :  { %54 = dma.hbm_to_vmem [thread:$0]  %s47_s15, 2048, %s49_s16, [#allocation7], %s556_s17, %s556_s17, %s557_s18  }
   0xb   :  { %545 = dma.done.wait [#allocation4], 64  }
   0xc   :  { %546 = vsyncadd [#allocation4], 4294967232 }
   0xd   :  { %547 = dma.done.wait [#allocation7], 2432  }
   0xe   :  { %548 = vsyncadd [#allocation7], 4294964864  ;;  %v77_v0 = vld [vmem:[#allocation6 + $0x10] sm:$0x33]  ;;  %vm103_vm0 = vcmask 1041408   ;;  %v430_v11 = vld [vmem:[#allocation8 + $0x30] sm:$0xff]  ;;  %v307_v55 = vstv %s629_s6 }
   0xf   :  { %v91_v1 = vunpack.c.l.b16 %v77_v0  ;;  %v92_v2 = vunpack.c.h.b16 %v77_v0  ;;  %v350_v3 = vld [vmem:[#allocation6] sm:$0xf]  ;;  %v431_v4 = vld [vmem:[#allocation8 + $0x38] sm:$0xff]  ;;  %v423_v8 = vld [vmem:[#allocation6 + $0x4] sm:$0xf0]  ;;  %vm99_vm1 = vcmask 162816  }
  0x10   :  { %v439_v5 = vld [vmem:[#allocation8 + $0x78] sm:$0xff]  ;;  %v422_v9 = vld [vmem:[#allocation6 + $0x4] sm:$0xf]  ;;  %v352_v10 = vld [vmem:[#allocation6 + $0x8] sm:$0xf0]  ;;  %276 = vmatpush.bf16.msra.mxu2 %v431_v4  ;;  %v351_v15 = vor.u32 %v423_v8, %v350_v3  ;;  %s337_s27 = sshll.u32 %s630_s7, 4  ;;  %s338_s27 = int_to_ptr.hbm [resolvable:$true] %s337_s27 }
  0x11   :  { %v95_v6 = vpack.c.b16 %v91_v1, %v91_v1  ;;  %v96_v7 = vpack.c.b16 %v92_v2, %v92_v2  ;;  %289 = vmatpush.bf16.msra.mxu3 %v439_v5  ;;  %v438_v12 = vld [vmem:[#allocation8 + $0x70] sm:$0xff]  ;;  %v355_v16 = vor.u32 %v422_v9, %v352_v10  ;;  %v429_v17 = vld [vmem:[#allocation8 + $0x28] sm:$0xff]  ;;  %v74_v19 = vld [vmem:[#allocation3] sm:$0xf]  ;;  %vm328_vm5 = vcmask 57344  }
  0x12   :  { %v437_v18 = vld [vmem:[#allocation8 + $0x68] sm:$0xff]  ;;  %v428_v20 = vld [vmem:[#allocation8 + $0x20] sm:$0xff]  ;;  %v427_v22 = vld [vmem:[#allocation8 + $0x18] sm:$0xff] }
  0x13   :  { %v105_v13 = vsel %vm103_vm0, %v95_v6, 0  ;;  %v108_v14 = vsel %vm103_vm0, %v96_v7, 0  ;;  %v436_v21 = vld [vmem:[#allocation8 + $0x60] sm:$0xff]  ;;  %v435_v23 = vld [vmem:[#allocation8 + $0x58] sm:$0xff]  ;;  %v426_v24 = vld [vmem:[#allocation8 + $0x10] sm:$0xff] }
  0x14   :  { %116 = vmatpush.bf16.msra.mxu0 %v105_v13  ;;  %129 = vmatpush.bf16.msra.mxu1 %v108_v14  ;;  %v434_v25 = vld [vmem:[#allocation8 + $0x50] sm:$0xff]  ;;  %v425_v26 = vld [vmem:[#allocation8 + $0x8] sm:$0xff]  ;;  %v424_v28 = vld [vmem:[#allocation8] sm:$0xff] }
  0x15   :  { %277 = vmatpush.bf16.msra.mxu2 %v430_v11  ;;  %290 = vmatpush.bf16.msra.mxu3 %v438_v12  ;;  %v433_v27 = vld [vmem:[#allocation8 + $0x48] sm:$0xff]  ;;  %v432_v29 = vld [vmem:[#allocation8 + $0x40] sm:$0xff] }
  0x16   :  { %v78_v30 = vld [vmem:[%s625_s2] sm:$0x3] }
  0x17   :  { %v80_v31 = vperm.slane %v78_v30, 0  ;;  %v81_v32 = vperm.slane %v78_v30, 1  ;;  %v448_v45 = vld [vmem:[%s627_s4] ss:$0 sm:$0xff]  ;;  %s558_s4 = smov [#allocation9]  }
  0x18   :  { %117 = vmatpush.bf16.msra.mxu0 %v351_v15  ;;  %130 = vmatpush.bf16.msra.mxu1 %v355_v16  ;;  %v305_v54 = vld [vmem:[%s628_s5] sm:$0x1]  ;;  %s335_s24 = sshll.u32 %s558_s4, 4  ;;  %s336_s24 = int_to_ptr.vmem [resolvable:$true] %s335_s24 }
  0x19   :  { %278 = vmatpush.bf16.msra.mxu2 %v429_v17  ;;  %291 = vmatpush.bf16.msra.mxu3 %v437_v18 }
  0x1b   :  { %356 = vmatmul.msk.bf16.vlgmr.msra.gmra.mxu0 %vm99_vm1, %v74_v19  ;;  %357 = vmatmul.msk.bf16.vlgmr.msra.gmra.mxu1 %vm99_vm1, %v74_v19 }
  0x1d   :  { %279 = vmatpush.bf16.msra.mxu2 %v428_v20  ;;  %292 = vmatpush.bf16.msra.mxu3 %v436_v21 }
  0x21   :  { %280 = vmatpush.bf16.msra.mxu2 %v427_v22  ;;  %293 = vmatpush.bf16.msra.mxu3 %v435_v23 }
  0x25   :  { %281 = vmatpush.bf16.msra.mxu2 %v426_v24  ;;  %294 = vmatpush.bf16.msra.mxu3 %v434_v25 }
  0x29   :  { %282 = vmatpush.bf16.msra.mxu2 %v425_v26  ;;  %295 = vmatpush.bf16.msra.mxu3 %v433_v27 }
  0x2d   :  { %283 = vmatpush.bf16.msra.mxu2 %v424_v28  ;;  %296 = vmatpush.bf16.msra.mxu3 %v432_v29 }
  0x98   :  { %v119_v33 = vpop.f32.mrf.mxu0  ;;  %v132_v34 = vpop.f32.mrf.mxu1 }
  0x99   :  { %v120_v35 = vadd.f32 %v119_v33, %v80_v31  ;;  %v133_v36 = vadd.f32 %v132_v34, %v81_v32 }
  0x9b   :  { %v138_v37 = vmul.f32 0.01, %v120_v35  ;;  %v139_v38 = vmul.f32 0.01, %v133_v36  ;;  %vm136_vm2 = vcmp.ge.f32.partialorder %v120_v35, 0.0  ;;  %vm137_vm3 = vcmp.ge.f32.partialorder %v133_v36, 0.0 }
  0x9d   :  { %v140_v39 = vsel %vm136_vm2, %v120_v35, %v138_v37  ;;  %v141_v40 = vsel %vm137_vm3, %v133_v36, %v139_v38 }
  0x9e   :  { %v142_v41 = vpack.c.bf16 %v140_v39, %v140_v39  ;;  %v143_v42 = vpack.c.bf16 %v141_v40, %v141_v40 }
  0xa0   :  { %v121_v43 = vpop.f32.mrf.mxu0  ;;  %v134_v44 = vpop.f32.mrf.mxu1  ;;  %284 = vmatmul.bf16.vlgmr.msra.gmra.mxu2 %v142_v41  ;;  %297 = vmatmul.bf16.vlgmr.msra.gmra.mxu3 %v143_v42 }
 0x123   :  { %v285_v46 = vpop.f32.mrf.mxu2  ;;  %v298_v47 = vpop.f32.mrf.mxu3 }
 0x124   :  { %v286_v48 = vadd.f32 %v448_v45, %v285_v46 }
 0x126   :  { %v299_v49 = vadd.f32 %v298_v47, %v286_v48 }
 0x128   :  { %vm302_vm4 = vcmp.ge.f32.partialorder %v299_v49, 0.0  ;;  %v303_v50 = vmul.f32 0.01, %v299_v49 }
 0x12a   :  { %v304_v51 = vsel %vm302_vm4, %v299_v49, %v303_v50 }
 0x12b   :  { %v287_v52 = vpop.f32.mrf.mxu2  ;;  %v300_v53 = vpop.f32.mrf.mxu3  ;;  %323 = vmatpush.xpose.msrb.mxu0 %v304_v51 }
 0x12e   :  { %324 = vmatmul.f32.vlgmr.msrb.gmra.mxu0 %v305_v54 }
 0x1ab   :  { %v325_v56 = vpop.f32.mrf.mxu0 }
 0x1ac   :  { %v326_v57 = vadd.f32 %v325_v56, %v307_v55 }
 0x1ae   :  { %329 = vst.msk [vmem:[#allocation9] sm:$0x1] %vm328_vm5, %v326_v57 }
 0x1af   :  { %340 = dma.vmem_to_hbm [thread:$0]  %s336_s24, 16, %s338_s27, [#allocation5]  }
 0x1b0   :  { %549 = dma.done.wait [#allocation5], 16  }
 0x1b1   :  { %550 = vsyncadd [#allocation5], 4294967280 }
 0x1b2   :  { %345 = vsyncpa [#allocation4], 1 }
 0x1b3   :  { %346 = vsyncpa [#allocation7], 1 }
 0x1b4   :  { %347 = vsyncpa [#allocation5], 1 }

</bundles_post_ra>
